<compile_context>
chip_gen: v7x
topology: tpu7x:2x2x1
jax: 0.10.0
libtpu: 0.0.40
codegen_flags: <defaults>
</compile_context>

<pallas_src>
import numpy as np
import jax
import jax.numpy as jnp
from jax.experimental import pallas as pl
from jax.experimental.pallas import tpu as pltpu


def _build_kernel(num_block, H, W, n_lanes, C, G):
    """n_lanes = Bt*HW : lane width of one grid step (Bt images concatenated)."""
    HW = H * W
    assert n_lanes % HW == 0
    # Static roll amounts: tap t=ky*3+kx needs y[n + d], d=(ky-1)*W+(kx-1),
    # rolled over the full concatenated lane axis (image-boundary wrap-arounds are
    # killed by the zero mask already folded into the depthwise weights).
    shifts = [(-((ky - 1) * W + (kx - 1))) % n_lanes for ky in range(3) for kx in range(3)]

    def kernel(x_ref, w1_ref, wdm_ref, w3_ref, vec_ref, o_ref):
        # x_ref  : (C, N)          N = Bt*HW, Bt images lane-concatenated
        # w1_ref : (NB, G, C)      bf16 folded project-in weights
        # wdm_ref: (NB, 9, G, N)   f32 folded depthwise weights * boundary mask
        # w3_ref : (NB, C, G)      bf16 folded project-out weights
        # vec_ref: (NB, 5, P, 1)   f32 [b1, a1, b2, a2, b3] (P = max(C, G), zero-padded)
        x = x_ref[...].astype(jnp.float32)              # residual carry stays f32
        for nb in range(num_block):
            vec = vec_ref[nb]                           # (5, P, 1)
            b1, a1 = vec[0, :G], vec[1, :G]
            b2, a2 = vec[2, :G], vec[3, :G]
            b3 = vec[4, :C]

            # --- 1x1 conv (C -> G) + BN + PReLU : one wide MXU matmul, bf16 operands ---
            y = jnp.dot(w1_ref[nb], x.astype(jnp.bfloat16),
                        preferred_element_type=jnp.float32) + b1
            y = jnp.where(y > 0, y, a1 * y)

            # --- depthwise 3x3, pad=1: 9-tap stencil via XLU roll, mask-folded weights.
            #     All rolls issued up front, products tree-summed for VALU ILP.
            #     (0-weights at image borders are exact for finite activations;
            #      non-finite inputs would leak as 0*Inf -> NaN.)
            prods = [y * wdm_ref[nb, 4]]                # center tap: no shift
            for t in range(9):
                if t == 4:
                    continue
                tap = pltpu.roll(y, shifts[t], axis=1)  # tap[:, n] == y[:, n + d_t]
                prods.append(tap * wdm_ref[nb, t])
            while len(prods) > 1:                       # balanced tree reduction
                nxt = [prods[i] + prods[i + 1] for i in range(0, len(prods) - 1, 2)]
                if len(prods) % 2:
                    nxt.append(prods[-1])
                prods = nxt
            z = prods[0] + b2
            z = jnp.where(z > 0, z, a2 * z)

            # --- 1x1 conv (G -> C) + BN, residual add (f32 carry) ---
            x = x + jnp.dot(w3_ref[nb], z.astype(jnp.bfloat16),
                            preferred_element_type=jnp.float32) + b3
        o_ref[...] = x.astype(o_ref.dtype)

    return kernel


def fold_params(p, eps=1e-5):
    """Fold eval-mode BatchNorm into the bias-free conv weights (pure JAX, wrapper-side)."""
    def bn_scale(g, v):
        return g / jnp.sqrt(v + eps)

    s1 = bn_scale(p["bn1_g"], p["bn1_v"])                       # (NB, G)
    w1f = p["w1"][..., 0, 0] * s1[..., None]                    # (NB, G, C)
    b1 = p["bn1_b"] - p["bn1_m"] * s1

    s2 = bn_scale(p["bn2_g"], p["bn2_v"])
    wdf = p["wd"][:, :, 0] * s2[..., None, None]                # (NB, G, 3, 3)
    b2 = p["bn2_b"] - p["bn2_m"] * s2

    s3 = bn_scale(p["bn3_g"], p["bn3_v"])
    w3f = p["w3"][..., 0, 0] * s3[..., None]                    # (NB, C, G)
    b3 = p["bn3_b"] - p["bn3_m"] * s3

    NB, G = b1.shape
    C = b3.shape[1]
    P = max(C, G)

    def pad(v):                                                  # (NB, K) -> (NB, P)
        k = v.shape[1]
        return jnp.pad(v, ((0, 0), (0, P - k))) if k < P else v

    vec = jnp.stack([pad(b1), pad(p["a1"]), pad(b2), pad(p["a2"]), pad(b3)],
                    axis=1)[..., None]                           # (NB, 5, P, 1)
    wdf9 = wdf.reshape(NB, G, 9).transpose(0, 2, 1)              # (NB, 9, G), tap-major
    return dict(w1f=w1f, wdf9=wdf9, w3f=w3f, vec=vec)


def _boundary_masks(H, W):
    """(9, HW) 0/1 masks: tap t=ky*3+kx is valid at flattened position n."""
    HW = H * W
    rows = np.arange(HW) // W
    cols = np.arange(HW) % W
    m = np.empty((9, HW), np.float32)
    for ky in range(3):
        for kx in range(3):
            ok = ((rows + ky - 1 >= 0) & (rows + ky - 1 < H) &
                  (cols + kx - 1 >= 0) & (cols + kx - 1 < W))
            m[ky * 3 + kx] = ok.astype(np.float32)
    return m


def residual_pallas(x_nchw, params, eps=1e-5, images_per_step=None):
    B, C, H, W = x_nchw.shape
    HW = H * W
    f = fold_params(params, eps)
    NB, G, _ = f["w1f"].shape

    if images_per_step is None:
        # Keep >=2 "parallel" grid steps when possible (both v7x TensorCores busy)
        # while amortizing per-step cost over B/2 images.  On v5e/v6e a single
        # fat step (images_per_step=B) is strictly better.
        images_per_step = B // 2 if (B >= 2 and B % 2 == 0) else B
    Bt = images_per_step
    assert B % Bt == 0, "batch must be divisible by images_per_step"
    nsteps = B // Bt
    N = Bt * HW

    # Fold boundary masks into the depthwise weights (removes a per-tap multiply).
    masks = jnp.asarray(np.tile(_boundary_masks(H, W), (1, Bt)))     # (9, N)
    wdm = f["wdf9"][:, :, :, None] * masks[None, :, None, :]         # (NB, 9, G, N) f32

    # MXU operands in bf16; residual carry and stencil stay f32 inside the kernel.
    w1_bf16 = f["w1f"].astype(jnp.bfloat16)
    w3_bf16 = f["w3f"].astype(jnp.bfloat16)

    # Lane-dense layout: channels on sublanes, images concatenated along the 128-lane
    # axis.  The (B,C,HW)->(C,B*HW) transpose is wrapper-side layout plumbing.
    x_cn = x_nchw.reshape(B, C, HW).transpose(1, 0, 2).reshape(C, B * HW)

    kernel = _build_kernel(NB, H, W, N, C, G)

    def full(a):
        return pl.BlockSpec(a.shape, lambda i, _nd=a.ndim: (0,) * _nd)

    out_cn = pl.pallas_call(
        kernel,
        out_shape=jax.ShapeDtypeStruct((C, B * HW), x_nchw.dtype),
        grid=(nsteps,),
        in_specs=[
            pl.BlockSpec((C, N), lambda i: (0, i)),   # Bt images per step, lane-dense
            full(w1_bf16), full(wdm), full(w3_bf16), full(f["vec"]),
        ],
        out_specs=pl.BlockSpec((C, N), lambda i: (0, i)),
        compiler_params=pltpu.CompilerParams(dimension_semantics=("parallel",)),
    )(x_cn, w1_bf16, wdm, w3_bf16, f["vec"])

    return out_cn.reshape(C, B, HW).transpose(1, 0, 2).reshape(B, C, H, W)


def residual_ref(x_nchw, params, eps=1e-5):
    """Pure-JAX NCHW reference (independent padded-stencil implementation, full f32)."""
    f = fold_params(params, eps)
    NB, G, _ = f["w1f"].shape
    B, C, H, W = x_nchw.shape
    x = x_nchw.astype(jnp.float32)
    for nb in range(NB):
        b1 = f["vec"][nb, 0, :G, 0]; a1 = f["vec"][nb, 1, :G, 0]
        b2 = f["vec"][nb, 2, :G, 0]; a2 = f["vec"][nb, 3, :G, 0]
        b3 = f["vec"][nb, 4, :C, 0]
        y = jnp.einsum("gc,bchw->bghw", f["w1f"][nb], x) + b1[None, :, None, None]
        y = jnp.where(y > 0, y, a1[None, :, None, None] * y)
        yp = jnp.pad(y, ((0, 0), (0, 0), (1, 1), (1, 1)))
        acc = jnp.zeros_like(y)
        for ky in range(3):
            for kx in range(3):
                wt = f["wdf9"][nb, ky * 3 + kx]                 # (G,)
                acc = acc + yp[:, :, ky:ky + H, kx:kx + W] * wt[None, :, None, None]
        z = acc + b2[None, :, None, None]
        z = jnp.where(z > 0, z, a2[None, :, None, None] * z)
        x = x + jnp.einsum("cg,bghw->bchw", f["w3f"][nb], z) + b3[None, :, None, None]
    return x.astype(x_nchw.dtype)


if __name__ == "__main__":
    # Small shapes consistent with the module: batch=2, channels=4, 16x16, groups=8, num_block=2.
    B, C, H, W = 2, 4, 16, 16
    G = 8     # `groups`
    NB = 2    # `num_block`

    key = jax.random.PRNGKey(0)
    ks = jax.random.split(key, 20)
    n = lambda k, shape, s=1.0: s * jax.random.normal(k, shape, jnp.float32)

    x = n(ks[0], (B, C, H, W))
    params = dict(
        # PyTorch parameter layouts, stacked over the NB blocks.
        w1=n(ks[1], (NB, G, C, 1, 1), 0.3),
        bn1_g=1.0 + n(ks[2], (NB, G), 0.1), bn1_b=n(ks[3], (NB, G), 0.1),
        bn1_m=n(ks[4], (NB, G), 0.1),
        bn1_v=jax.random.uniform(ks[5], (NB, G), jnp.float32, 0.5, 1.5),
        a1=0.25 + n(ks[6], (NB, G), 0.05),
        wd=n(ks[7], (NB, G, 1, 3, 3), 0.3),
        bn2_g=1.0 + n(ks[8], (NB, G), 0.1), bn2_b=n(ks[9], (NB, G), 0.1),
        bn2_m=n(ks[10], (NB, G), 0.1),
        bn2_v=jax.random.uniform(ks[11], (NB, G), jnp.float32, 0.5, 1.5),
        a2=0.25 + n(ks[12], (NB, G), 0.05),
        w3=n(ks[13], (NB, C, G, 1, 1), 0.3),
        bn3_g=1.0 + n(ks[14], (NB, C), 0.1), bn3_b=n(ks[15], (NB, C), 0.1),
        bn3_m=n(ks[16], (NB, C), 0.1),
        bn3_v=jax.random.uniform(ks[17], (NB, C), jnp.float32, 0.5, 1.5),
    )

    out = jax.block_until_ready(residual_pallas(x, params))
    ref = jax.block_until_ready(residual_ref(x, params))

    assert out.shape == (B, C, H, W), out.shape
    # Tolerance accounts for bf16 MXU operands (weights + activation casts);
    # residual carry / accumulation remain f32.
    np.testing.assert_allclose(np.asarray(out), np.asarray(ref), rtol=5e-2, atol=5e-2)
    print("KERNEL_OK")
</pallas_src>

<mosaic_0001>
module attributes {stable_mosaic.version = 11 : i64} {
  func.func @kernel(%arg0: i32, %arg1: memref<4x256xf32, #tpu.memory_space<vmem>>, %arg2: memref<2x8x4xbf16, #tpu.memory_space<vmem>>, %arg3: memref<2x9x8x256xf32, #tpu.memory_space<vmem>>, %arg4: memref<2x4x8xbf16, #tpu.memory_space<vmem>>, %arg5: memref<2x5x8x1xf32, #tpu.memory_space<vmem>>, %arg6: memref<4x256xf32, #tpu.memory_space<vmem>>) attributes {dimension_semantics = [#tpu.dimension_semantics<parallel>], iteration_bounds = array<i64: 2>, scalar_prefetch = 0 : i64, scratch_operands = 0 : i64, tpu.core_type = #tpu.core_type<tc>, window_params = [{transform_indices = @transform_0, window_bounds = array<i64: 4, 256>}, {pipeline_mode = #tpu.pipeline_mode<synchronous>, transform_indices = @transform_1, window_bounds = array<i64: 2, 8, 4>}, {pipeline_mode = #tpu.pipeline_mode<synchronous>, transform_indices = @transform_2, window_bounds = array<i64: 2, 9, 8, 256>}, {pipeline_mode = #tpu.pipeline_mode<synchronous>, transform_indices = @transform_3, window_bounds = array<i64: 2, 4, 8>}, {pipeline_mode = #tpu.pipeline_mode<synchronous>, transform_indices = @transform_4, window_bounds = array<i64: 2, 5, 8, 1>}, {transform_indices = @transform_5, window_bounds = array<i64: 4, 256>}]} {
    %c0 = arith.constant 0 : index
    %c0_0 = arith.constant 0 : index
    %0 = vector.load %arg1[%c0, %c0_0] : memref<4x256xf32, #tpu.memory_space<vmem>>, vector<4x256xf32>
    %c0_1 = arith.constant 0 : index
    %c0_2 = arith.constant 0 : index
    %c0_3 = arith.constant 0 : index
    %c0_4 = arith.constant 0 : index
    %1 = vector.load %arg5[%c0_1, %c0_2, %c0_3, %c0_4] : memref<2x5x8x1xf32, #tpu.memory_space<vmem>>, vector<1x5x8x1xf32>
    %2 = vector.shape_cast %1 : vector<1x5x8x1xf32> to vector<5x8x1xf32>
    %3 = vector.extract_strided_slice %2 {offsets = [0, 0, 0], sizes = [1, 8, 1], strides = [1, 1, 1]} : vector<5x8x1xf32> to vector<1x8x1xf32>
    %4 = vector.shape_cast %3 : vector<1x8x1xf32> to vector<8x1xf32>
    %5 = vector.extract_strided_slice %2 {offsets = [1, 0, 0], sizes = [1, 8, 1], strides = [1, 1, 1]} : vector<5x8x1xf32> to vector<1x8x1xf32>
    %6 = vector.shape_cast %5 : vector<1x8x1xf32> to vector<8x1xf32>
    %7 = vector.extract_strided_slice %2 {offsets = [2, 0, 0], sizes = [1, 8, 1], strides = [1, 1, 1]} : vector<5x8x1xf32> to vector<1x8x1xf32>
    %8 = vector.shape_cast %7 : vector<1x8x1xf32> to vector<8x1xf32>
    %9 = vector.extract_strided_slice %2 {offsets = [3, 0, 0], sizes = [1, 8, 1], strides = [1, 1, 1]} : vector<5x8x1xf32> to vector<1x8x1xf32>
    %10 = vector.shape_cast %9 : vector<1x8x1xf32> to vector<8x1xf32>
    %11 = vector.extract_strided_slice %2 {offsets = [4, 0, 0], sizes = [1, 4, 1], strides = [1, 1, 1]} : vector<5x8x1xf32> to vector<1x4x1xf32>
    %12 = vector.shape_cast %11 : vector<1x4x1xf32> to vector<4x1xf32>
    %c0_5 = arith.constant 0 : index
    %c0_6 = arith.constant 0 : index
    %c0_7 = arith.constant 0 : index
    %13 = vector.load %arg2[%c0_5, %c0_6, %c0_7] : memref<2x8x4xbf16, #tpu.memory_space<vmem>>, vector<1x8x4xbf16>
    %14 = vector.shape_cast %13 : vector<1x8x4xbf16> to vector<8x4xbf16>
    %15 = arith.truncf %0 : vector<4x256xf32> to vector<4x256xbf16>
    %cst = arith.constant dense<0.000000e+00> : vector<8x256xf32>
    %16 = tpu.matmul %14, %15, %cst {dimension_numbers = #tpu.dot_dimension_numbers<[1], [0], [0], [1], [0, 0, 1, 1], [], []>} : vector<8x4xbf16>, vector<4x256xbf16>, vector<8x256xf32> -> vector<8x256xf32>
    %17 = vector.broadcast %4 : vector<8x1xf32> to vector<8x256xf32>
    %18 = arith.addf %16, %17 : vector<8x256xf32>
    %cst_8 = arith.constant 0.000000e+00 : f32
    %19 = vector.broadcast %cst_8 : f32 to vector<8x256xf32>
    %20 = arith.cmpf ogt, %18, %19 : vector<8x256xf32>
    %21 = vector.broadcast %6 : vector<8x1xf32> to vector<8x256xf32>
    %22 = arith.mulf %21, %18 : vector<8x256xf32>
    %23 = arith.select %20, %18, %22 : vector<8x256xi1>, vector<8x256xf32>
    %c0_9 = arith.constant 0 : index
    %c4 = arith.constant 4 : index
    %c0_10 = arith.constant 0 : index
    %c0_11 = arith.constant 0 : index
    %24 = vector.load %arg3[%c0_9, %c4, %c0_10, %c0_11] : memref<2x9x8x256xf32, #tpu.memory_space<vmem>>, vector<1x1x8x256xf32>
    %25 = vector.shape_cast %24 : vector<1x1x8x256xf32> to vector<8x256xf32>
    %26 = arith.mulf %23, %25 : vector<8x256xf32>
    %c17_i32 = arith.constant 17 : i32
    %27 = tpu.dynamic_rotate %23 by %c17_i32 dim 1 : vector<8x256xf32>, i32 -> vector<8x256xf32>
    %c0_12 = arith.constant 0 : index
    %c0_13 = arith.constant 0 : index
    %c0_14 = arith.constant 0 : index
    %c0_15 = arith.constant 0 : index
    %28 = vector.load %arg3[%c0_12, %c0_13, %c0_14, %c0_15] : memref<2x9x8x256xf32, #tpu.memory_space<vmem>>, vector<1x1x8x256xf32>
    %29 = vector.shape_cast %28 : vector<1x1x8x256xf32> to vector<8x256xf32>
    %30 = arith.mulf %27, %29 : vector<8x256xf32>
    %c16_i32 = arith.constant 16 : i32
    %31 = tpu.dynamic_rotate %23 by %c16_i32 dim 1 : vector<8x256xf32>, i32 -> vector<8x256xf32>
    %c0_16 = arith.constant 0 : index
    %c1 = arith.constant 1 : index
    %c0_17 = arith.constant 0 : index
    %c0_18 = arith.constant 0 : index
    %32 = vector.load %arg3[%c0_16, %c1, %c0_17, %c0_18] : memref<2x9x8x256xf32, #tpu.memory_space<vmem>>, vector<1x1x8x256xf32>
    %33 = vector.shape_cast %32 : vector<1x1x8x256xf32> to vector<8x256xf32>
    %34 = arith.mulf %31, %33 : vector<8x256xf32>
    %c15_i32 = arith.constant 15 : i32
    %35 = tpu.dynamic_rotate %23 by %c15_i32 dim 1 : vector<8x256xf32>, i32 -> vector<8x256xf32>
    %c0_19 = arith.constant 0 : index
    %c2 = arith.constant 2 : index
    %c0_20 = arith.constant 0 : index
    %c0_21 = arith.constant 0 : index
    %36 = vector.load %arg3[%c0_19, %c2, %c0_20, %c0_21] : memref<2x9x8x256xf32, #tpu.memory_space<vmem>>, vector<1x1x8x256xf32>
    %37 = vector.shape_cast %36 : vector<1x1x8x256xf32> to vector<8x256xf32>
    %38 = arith.mulf %35, %37 : vector<8x256xf32>
    %c1_i32 = arith.constant 1 : i32
    %39 = tpu.dynamic_rotate %23 by %c1_i32 dim 1 : vector<8x256xf32>, i32 -> vector<8x256xf32>
    %c0_22 = arith.constant 0 : index
    %c3 = arith.constant 3 : index
    %c0_23 = arith.constant 0 : index
    %c0_24 = arith.constant 0 : index
    %40 = vector.load %arg3[%c0_22, %c3, %c0_23, %c0_24] : memref<2x9x8x256xf32, #tpu.memory_space<vmem>>, vector<1x1x8x256xf32>
    %41 = vector.shape_cast %40 : vector<1x1x8x256xf32> to vector<8x256xf32>
    %42 = arith.mulf %39, %41 : vector<8x256xf32>
    %c255_i32 = arith.constant 255 : i32
    %43 = tpu.dynamic_rotate %23 by %c255_i32 dim 1 : vector<8x256xf32>, i32 -> vector<8x256xf32>
    %c0_25 = arith.constant 0 : index
    %c5 = arith.constant 5 : index
    %c0_26 = arith.constant 0 : index
    %c0_27 = arith.constant 0 : index
    %44 = vector.load %arg3[%c0_25, %c5, %c0_26, %c0_27] : memref<2x9x8x256xf32, #tpu.memory_space<vmem>>, vector<1x1x8x256xf32>
    %45 = vector.shape_cast %44 : vector<1x1x8x256xf32> to vector<8x256xf32>
    %46 = arith.mulf %43, %45 : vector<8x256xf32>
    %c241_i32 = arith.constant 241 : i32
    %47 = tpu.dynamic_rotate %23 by %c241_i32 dim 1 : vector<8x256xf32>, i32 -> vector<8x256xf32>
    %c0_28 = arith.constant 0 : index
    %c6 = arith.constant 6 : index
    %c0_29 = arith.constant 0 : index
    %c0_30 = arith.constant 0 : index
    %48 = vector.load %arg3[%c0_28, %c6, %c0_29, %c0_30] : memref<2x9x8x256xf32, #tpu.memory_space<vmem>>, vector<1x1x8x256xf32>
    %49 = vector.shape_cast %48 : vector<1x1x8x256xf32> to vector<8x256xf32>
    %50 = arith.mulf %47, %49 : vector<8x256xf32>
    %c240_i32 = arith.constant 240 : i32
    %51 = tpu.dynamic_rotate %23 by %c240_i32 dim 1 : vector<8x256xf32>, i32 -> vector<8x256xf32>
    %c0_31 = arith.constant 0 : index
    %c7 = arith.constant 7 : index
    %c0_32 = arith.constant 0 : index
    %c0_33 = arith.constant 0 : index
    %52 = vector.load %arg3[%c0_31, %c7, %c0_32, %c0_33] : memref<2x9x8x256xf32, #tpu.memory_space<vmem>>, vector<1x1x8x256xf32>
    %53 = vector.shape_cast %52 : vector<1x1x8x256xf32> to vector<8x256xf32>
    %54 = arith.mulf %51, %53 : vector<8x256xf32>
    %c239_i32 = arith.constant 239 : i32
    %55 = tpu.dynamic_rotate %23 by %c239_i32 dim 1 : vector<8x256xf32>, i32 -> vector<8x256xf32>
    %c0_34 = arith.constant 0 : index
    %c8 = arith.constant 8 : index
    %c0_35 = arith.constant 0 : index
    %c0_36 = arith.constant 0 : index
    %56 = vector.load %arg3[%c0_34, %c8, %c0_35, %c0_36] : memref<2x9x8x256xf32, #tpu.memory_space<vmem>>, vector<1x1x8x256xf32>
    %57 = vector.shape_cast %56 : vector<1x1x8x256xf32> to vector<8x256xf32>
    %58 = arith.mulf %55, %57 : vector<8x256xf32>
    %59 = arith.addf %26, %30 : vector<8x256xf32>
    %60 = arith.addf %34, %38 : vector<8x256xf32>
    %61 = arith.addf %42, %46 : vector<8x256xf32>
    %62 = arith.addf %50, %54 : vector<8x256xf32>
    %63 = arith.addf %59, %60 : vector<8x256xf32>
    %64 = arith.addf %61, %62 : vector<8x256xf32>
    %65 = arith.addf %63, %64 : vector<8x256xf32>
    %66 = arith.addf %65, %58 : vector<8x256xf32>
    %67 = vector.broadcast %8 : vector<8x1xf32> to vector<8x256xf32>
    %68 = arith.addf %66, %67 : vector<8x256xf32>
    %cst_37 = arith.constant 0.000000e+00 : f32
    %69 = vector.broadcast %cst_37 : f32 to vector<8x256xf32>
    %70 = arith.cmpf ogt, %68, %69 : vector<8x256xf32>
    %71 = vector.broadcast %10 : vector<8x1xf32> to vector<8x256xf32>
    %72 = arith.mulf %71, %68 : vector<8x256xf32>
    %73 = arith.select %70, %68, %72 : vector<8x256xi1>, vector<8x256xf32>
    %c0_38 = arith.constant 0 : index
    %c0_39 = arith.constant 0 : index
    %c0_40 = arith.constant 0 : index
    %74 = vector.load %arg4[%c0_38, %c0_39, %c0_40] : memref<2x4x8xbf16, #tpu.memory_space<vmem>>, vector<1x4x8xbf16>
    %75 = vector.shape_cast %74 : vector<1x4x8xbf16> to vector<4x8xbf16>
    %76 = arith.truncf %73 : vector<8x256xf32> to vector<8x256xbf16>
    %cst_41 = arith.constant dense<0.000000e+00> : vector<4x256xf32>
    %77 = tpu.matmul %75, %76, %cst_41 {dimension_numbers = #tpu.dot_dimension_numbers<[1], [0], [0], [1], [0, 0, 1, 1], [], []>} : vector<4x8xbf16>, vector<8x256xbf16>, vector<4x256xf32> -> vector<4x256xf32>
    %78 = arith.addf %0, %77 : vector<4x256xf32>
    %79 = vector.broadcast %12 : vector<4x1xf32> to vector<4x256xf32>
    %80 = arith.addf %78, %79 : vector<4x256xf32>
    %c1_42 = arith.constant 1 : index
    %c0_43 = arith.constant 0 : index
    %c0_44 = arith.constant 0 : index
    %c0_45 = arith.constant 0 : index
    %81 = vector.load %arg5[%c1_42, %c0_43, %c0_44, %c0_45] : memref<2x5x8x1xf32, #tpu.memory_space<vmem>>, vector<1x5x8x1xf32>
    %82 = vector.shape_cast %81 : vector<1x5x8x1xf32> to vector<5x8x1xf32>
    %83 = vector.extract_strided_slice %82 {offsets = [0, 0, 0], sizes = [1, 8, 1], strides = [1, 1, 1]} : vector<5x8x1xf32> to vector<1x8x1xf32>
    %84 = vector.shape_cast %83 : vector<1x8x1xf32> to vector<8x1xf32>
    %85 = vector.extract_strided_slice %82 {offsets = [1, 0, 0], sizes = [1, 8, 1], strides = [1, 1, 1]} : vector<5x8x1xf32> to vector<1x8x1xf32>
    %86 = vector.shape_cast %85 : vector<1x8x1xf32> to vector<8x1xf32>
    %87 = vector.extract_strided_slice %82 {offsets = [2, 0, 0], sizes = [1, 8, 1], strides = [1, 1, 1]} : vector<5x8x1xf32> to vector<1x8x1xf32>
    %88 = vector.shape_cast %87 : vector<1x8x1xf32> to vector<8x1xf32>
    %89 = vector.extract_strided_slice %82 {offsets = [3, 0, 0], sizes = [1, 8, 1], strides = [1, 1, 1]} : vector<5x8x1xf32> to vector<1x8x1xf32>
    %90 = vector.shape_cast %89 : vector<1x8x1xf32> to vector<8x1xf32>
    %91 = vector.extract_strided_slice %82 {offsets = [4, 0, 0], sizes = [1, 4, 1], strides = [1, 1, 1]} : vector<5x8x1xf32> to vector<1x4x1xf32>
    %92 = vector.shape_cast %91 : vector<1x4x1xf32> to vector<4x1xf32>
    %c1_46 = arith.constant 1 : index
    %c0_47 = arith.constant 0 : index
    %c0_48 = arith.constant 0 : index
    %93 = vector.load %arg2[%c1_46, %c0_47, %c0_48] : memref<2x8x4xbf16, #tpu.memory_space<vmem>>, vector<1x8x4xbf16>
    %94 = vector.shape_cast %93 : vector<1x8x4xbf16> to vector<8x4xbf16>
    %95 = arith.truncf %80 : vector<4x256xf32> to vector<4x256xbf16>
    %cst_49 = arith.constant dense<0.000000e+00> : vector<8x256xf32>
    %96 = tpu.matmul %94, %95, %cst_49 {dimension_numbers = #tpu.dot_dimension_numbers<[1], [0], [0], [1], [0, 0, 1, 1], [], []>} : vector<8x4xbf16>, vector<4x256xbf16>, vector<8x256xf32> -> vector<8x256xf32>
    %97 = vector.broadcast %84 : vector<8x1xf32> to vector<8x256xf32>
    %98 = arith.addf %96, %97 : vector<8x256xf32>
    %cst_50 = arith.constant 0.000000e+00 : f32
    %99 = vector.broadcast %cst_50 : f32 to vector<8x256xf32>
    %100 = arith.cmpf ogt, %98, %99 : vector<8x256xf32>
    %101 = vector.broadcast %86 : vector<8x1xf32> to vector<8x256xf32>
    %102 = arith.mulf %101, %98 : vector<8x256xf32>
    %103 = arith.select %100, %98, %102 : vector<8x256xi1>, vector<8x256xf32>
    %c1_51 = arith.constant 1 : index
    %c4_52 = arith.constant 4 : index
    %c0_53 = arith.constant 0 : index
    %c0_54 = arith.constant 0 : index
    %104 = vector.load %arg3[%c1_51, %c4_52, %c0_53, %c0_54] : memref<2x9x8x256xf32, #tpu.memory_space<vmem>>, vector<1x1x8x256xf32>
    %105 = vector.shape_cast %104 : vector<1x1x8x256xf32> to vector<8x256xf32>
    %106 = arith.mulf %103, %105 : vector<8x256xf32>
    %c17_i32_55 = arith.constant 17 : i32
    %107 = tpu.dynamic_rotate %103 by %c17_i32_55 dim 1 : vector<8x256xf32>, i32 -> vector<8x256xf32>
    %c1_56 = arith.constant 1 : index
    %c0_57 = arith.constant 0 : index
    %c0_58 = arith.constant 0 : index
    %c0_59 = arith.constant 0 : index
    %108 = vector.load %arg3[%c1_56, %c0_57, %c0_58, %c0_59] : memref<2x9x8x256xf32, #tpu.memory_space<vmem>>, vector<1x1x8x256xf32>
    %109 = vector.shape_cast %108 : vector<1x1x8x256xf32> to vector<8x256xf32>
    %110 = arith.mulf %107, %109 : vector<8x256xf32>
    %c16_i32_60 = arith.constant 16 : i32
    %111 = tpu.dynamic_rotate %103 by %c16_i32_60 dim 1 : vector<8x256xf32>, i32 -> vector<8x256xf32>
    %c1_61 = arith.constant 1 : index
    %c1_62 = arith.constant 1 : index
    %c0_63 = arith.constant 0 : index
    %c0_64 = arith.constant 0 : index
    %112 = vector.load %arg3[%c1_61, %c1_62, %c0_63, %c0_64] : memref<2x9x8x256xf32, #tpu.memory_space<vmem>>, vector<1x1x8x256xf32>
    %113 = vector.shape_cast %112 : vector<1x1x8x256xf32> to vector<8x256xf32>
    %114 = arith.mulf %111, %113 : vector<8x256xf32>
    %c15_i32_65 = arith.constant 15 : i32
    %115 = tpu.dynamic_rotate %103 by %c15_i32_65 dim 1 : vector<8x256xf32>, i32 -> vector<8x256xf32>
    %c1_66 = arith.constant 1 : index
    %c2_67 = arith.constant 2 : index
    %c0_68 = arith.constant 0 : index
    %c0_69 = arith.constant 0 : index
    %116 = vector.load %arg3[%c1_66, %c2_67, %c0_68, %c0_69] : memref<2x9x8x256xf32, #tpu.memory_space<vmem>>, vector<1x1x8x256xf32>
    %117 = vector.shape_cast %116 : vector<1x1x8x256xf32> to vector<8x256xf32>
    %118 = arith.mulf %115, %117 : vector<8x256xf32>
    %c1_i32_70 = arith.constant 1 : i32
    %119 = tpu.dynamic_rotate %103 by %c1_i32_70 dim 1 : vector<8x256xf32>, i32 -> vector<8x256xf32>
    %c1_71 = arith.constant 1 : index
    %c3_72 = arith.constant 3 : index
    %c0_73 = arith.constant 0 : index
    %c0_74 = arith.constant 0 : index
    %120 = vector.load %arg3[%c1_71, %c3_72, %c0_73, %c0_74] : memref<2x9x8x256xf32, #tpu.memory_space<vmem>>, vector<1x1x8x256xf32>
    %121 = vector.shape_cast %120 : vector<1x1x8x256xf32> to vector<8x256xf32>
    %122 = arith.mulf %119, %121 : vector<8x256xf32>
    %c255_i32_75 = arith.constant 255 : i32
    %123 = tpu.dynamic_rotate %103 by %c255_i32_75 dim 1 : vector<8x256xf32>, i32 -> vector<8x256xf32>
    %c1_76 = arith.constant 1 : index
    %c5_77 = arith.constant 5 : index
    %c0_78 = arith.constant 0 : index
    %c0_79 = arith.constant 0 : index
    %124 = vector.load %arg3[%c1_76, %c5_77, %c0_78, %c0_79] : memref<2x9x8x256xf32, #tpu.memory_space<vmem>>, vector<1x1x8x256xf32>
    %125 = vector.shape_cast %124 : vector<1x1x8x256xf32> to vector<8x256xf32>
    %126 = arith.mulf %123, %125 : vector<8x256xf32>
    %c241_i32_80 = arith.constant 241 : i32
    %127 = tpu.dynamic_rotate %103 by %c241_i32_80 dim 1 : vector<8x256xf32>, i32 -> vector<8x256xf32>
    %c1_81 = arith.constant 1 : index
    %c6_82 = arith.constant 6 : index
    %c0_83 = arith.constant 0 : index
    %c0_84 = arith.constant 0 : index
    %128 = vector.load %arg3[%c1_81, %c6_82, %c0_83, %c0_84] : memref<2x9x8x256xf32, #tpu.memory_space<vmem>>, vector<1x1x8x256xf32>
    %129 = vector.shape_cast %128 : vector<1x1x8x256xf32> to vector<8x256xf32>
    %130 = arith.mulf %127, %129 : vector<8x256xf32>
    %c240_i32_85 = arith.constant 240 : i32
    %131 = tpu.dynamic_rotate %103 by %c240_i32_85 dim 1 : vector<8x256xf32>, i32 -> vector<8x256xf32>
    %c1_86 = arith.constant 1 : index
    %c7_87 = arith.constant 7 : index
    %c0_88 = arith.constant 0 : index
    %c0_89 = arith.constant 0 : index
    %132 = vector.load %arg3[%c1_86, %c7_87, %c0_88, %c0_89] : memref<2x9x8x256xf32, #tpu.memory_space<vmem>>, vector<1x1x8x256xf32>
    %133 = vector.shape_cast %132 : vector<1x1x8x256xf32> to vector<8x256xf32>
    %134 = arith.mulf %131, %133 : vector<8x256xf32>
    %c239_i32_90 = arith.constant 239 : i32
    %135 = tpu.dynamic_rotate %103 by %c239_i32_90 dim 1 : vector<8x256xf32>, i32 -> vector<8x256xf32>
    %c1_91 = arith.constant 1 : index
    %c8_92 = arith.constant 8 : index
    %c0_93 = arith.constant 0 : index
    %c0_94 = arith.constant 0 : index
    %136 = vector.load %arg3[%c1_91, %c8_92, %c0_93, %c0_94] : memref<2x9x8x256xf32, #tpu.memory_space<vmem>>, vector<1x1x8x256xf32>
    %137 = vector.shape_cast %136 : vector<1x1x8x256xf32> to vector<8x256xf32>
    %138 = arith.mulf %135, %137 : vector<8x256xf32>
    %139 = arith.addf %106, %110 : vector<8x256xf32>
    %140 = arith.addf %114, %118 : vector<8x256xf32>
    %141 = arith.addf %122, %126 : vector<8x256xf32>
    %142 = arith.addf %130, %134 : vector<8x256xf32>
    %143 = arith.addf %139, %140 : vector<8x256xf32>
    %144 = arith.addf %141, %142 : vector<8x256xf32>
    %145 = arith.addf %143, %144 : vector<8x256xf32>
    %146 = arith.addf %145, %138 : vector<8x256xf32>
    %147 = vector.broadcast %88 : vector<8x1xf32> to vector<8x256xf32>
    %148 = arith.addf %146, %147 : vector<8x256xf32>
    %cst_95 = arith.constant 0.000000e+00 : f32
    %149 = vector.broadcast %cst_95 : f32 to vector<8x256xf32>
    %150 = arith.cmpf ogt, %148, %149 : vector<8x256xf32>
    %151 = vector.broadcast %90 : vector<8x1xf32> to vector<8x256xf32>
    %152 = arith.mulf %151, %148 : vector<8x256xf32>
    %153 = arith.select %150, %148, %152 : vector<8x256xi1>, vector<8x256xf32>
    %c1_96 = arith.constant 1 : index
    %c0_97 = arith.constant 0 : index
    %c0_98 = arith.constant 0 : index
    %154 = vector.load %arg4[%c1_96, %c0_97, %c0_98] : memref<2x4x8xbf16, #tpu.memory_space<vmem>>, vector<1x4x8xbf16>
    %155 = vector.shape_cast %154 : vector<1x4x8xbf16> to vector<4x8xbf16>
    %156 = arith.truncf %153 : vector<8x256xf32> to vector<8x256xbf16>
    %cst_99 = arith.constant dense<0.000000e+00> : vector<4x256xf32>
    %157 = tpu.matmul %155, %156, %cst_99 {dimension_numbers = #tpu.dot_dimension_numbers<[1], [0], [0], [1], [0, 0, 1, 1], [], []>} : vector<4x8xbf16>, vector<8x256xbf16>, vector<4x256xf32> -> vector<4x256xf32>
    %158 = arith.addf %80, %157 : vector<4x256xf32>
    %159 = vector.broadcast %92 : vector<4x1xf32> to vector<4x256xf32>
    %160 = arith.addf %158, %159 : vector<4x256xf32>
    %c0_100 = arith.constant 0 : index
    %c0_101 = arith.constant 0 : index
    %161 = vector.load %arg6[%c0_100, %c0_101] : memref<4x256xf32, #tpu.memory_space<vmem>>, vector<4x256xf32>
    tpu.vector_store %arg6[%c0_100, %c0_101], %160 {strides = array<i32>} : memref<4x256xf32, #tpu.memory_space<vmem>>, vector<4x256xf32>,
    return
  }
  func.func @transform_0(%arg0: i32) -> (i32, i32) {
    %c0_i32 = arith.constant 0 : i32
    %c0_i32_0 = arith.constant 0 : i32
    return %c0_i32, %arg0 : i32, i32
  }
  func.func @transform_1(%arg0: i32) -> (i32, i32, i32) {
    %c0_i32 = arith.constant 0 : i32
    %c0_i32_0 = arith.constant 0 : i32
    %c0_i32_1 = arith.constant 0 : i32
    %c0_i32_2 = arith.constant 0 : i32
    return %c0_i32, %c0_i32_0, %c0_i32_1 : i32, i32, i32
  }
  func.func @transform_2(%arg0: i32) -> (i32, i32, i32, i32) {
    %c0_i32 = arith.constant 0 : i32
    %c0_i32_0 = arith.constant 0 : i32
    %c0_i32_1 = arith.constant 0 : i32
    %c0_i32_2 = arith.constant 0 : i32
    %c0_i32_3 = arith.constant 0 : i32
    return %c0_i32, %c0_i32_0, %c0_i32_1, %c0_i32_2 : i32, i32, i32, i32
  }
  func.func @transform_3(%arg0: i32) -> (i32, i32, i32) {
    %c0_i32 = arith.constant 0 : i32
    %c0_i32_0 = arith.constant 0 : i32
    %c0_i32_1 = arith.constant 0 : i32
    %c0_i32_2 = arith.constant 0 : i32
    return %c0_i32, %c0_i32_0, %c0_i32_1 : i32, i32, i32
  }
  func.func @transform_4(%arg0: i32) -> (i32, i32, i32, i32) {
    %c0_i32 = arith.constant 0 : i32
    %c0_i32_0 = arith.constant 0 : i32
    %c0_i32_1 = arith.constant 0 : i32
    %c0_i32_2 = arith.constant 0 : i32
    %c0_i32_3 = arith.constant 0 : i32
    return %c0_i32, %c0_i32_0, %c0_i32_1, %c0_i32_2 : i32, i32, i32, i32
  }
  func.func @transform_5(%arg0: i32) -> (i32, i32) {
    %c0_i32 = arith.constant 0 : i32
    %c0_i32_0 = arith.constant 0 : i32
    return %c0_i32, %arg0 : i32, i32
  }
}

</mosaic_0001>

<bundles_post_ra>
// kernel: tpu_custom_call.1
= control target key start
LH: loop header
LB: loop body
LE: loop exit
PB: predicated region body
PF: predicated region fallthrough
CT: control target
= control target key end

     0   :  { %10 = vsyncpa [#allocation3], 0  ;;  %s1495_s0 = inlined_call_operand.vmem [shape: f32[4,512], index: 0, kind: input, shape index: {}]   ;;  %s1496_s1 = inlined_call_operand.vmem [shape: bf16[2,8,4], index: 1, kind: input, shape index: {}]   ;;  %s1497_s2 = inlined_call_operand.hbm [shape: f32[2,9,8,256], index: 2, kind: input, shape index: {}]   ;;  %s1498_s3 = inlined_call_operand.vmem [shape: bf16[2,4,8], index: 3, kind: input, shape index: {}]   ;;  %s1499_s4 = inlined_call_operand.vmem [shape: f32[2,5,8,1], index: 4, kind: input, shape index: {}]   ;;  %s1500_s5 = inlined_call_operand.hbm [shape: f32[4,512], index: 5, kind: output, shape index: {}]  }
   0x1   :  { %11 = vsyncpa [#allocation4], 0 }
   0x2   :  { %13 = vsyncpa [#allocation4 + $0x1], 0  ;;  %s1131_s18 = smov 0   ;;  %s1133_s19 = smov 0  }
   0x3   :  { %s1135_s20 = smov 0   ;;  %s1137_s21 = smov 0  }
   0x4 LB: > { %s1152_s22 = sadd.s32 4294967295, %s1085_s21   ;;  %s896_s23 = sadd.s32 4294967294, %s1085_s21   ;;  %s1085_s21 = sphi %s1137_s21, %s1516_s21   ;;  %s1081_s20 = sphi %s1135_s20, %s1515_s20   ;;  %s1077_s19 = sphi %s1133_s19, %s1514_s19   ;;  %s1073_s18 = sphi %s1131_s18, %s1513_s18  }
   0x5   : > { %s1156_s24 = sadd.s32 1, %s1085_s21   ;;  %s136_s25 = sadd.s32 1, %s1081_s20 }
   0x6   : > { %s133_s26 = ssub.s32 %s1085_s21, %s1156_s24  ;;  %p146_p0 = scmp.ne.s32.totalorder %s1081_s20, %s1077_s19 }
   0x7   : > { %p134_p1 = scmp.eq.s32.totalorder %s133_s26, 0  ;;  %p147_p2 = scmp.eq.s32.totalorder %s1152_s22, 1 }
   0x8   : > { %p152_p3 = scmp.ne.s32.totalorder %s1077_s19, %s1073_s18  ;;  %p153_p4 = scmp.eq.s32.totalorder %s896_s23, 1 }
   0x9   : > { %s1167_s27 = scalar_select %p134_p1, %s1081_s20, %s136_s25  }
   0xa   : > { %p1169_p5 = por %p147_p2, %p146_p0  ;;  %p1173_p6 = por %p153_p4, %p152_p3 }
   0xb   : > { %p897_p7 = scmp.ge.s32.totalorder %s1085_s21, 1  ;;  %p160_p8 = scmp.lt.s32.totalorder %s1085_s21, 3 }
   0xc   : > { %s1504_s28 = scalar_select %p1169_p5, 1, 0 }
   0xd   : > { %s1505_s29 = scalar_select %p1173_p6, 1, 0 }
   0xe   : > { %p1501_p9 = scmp.eq.s32.totalorder %s1152_s22, 0  ;;  %p1180_p10 = pnand %p897_p7, %p160_p8 }
   0xf   : > { %s1087_s6 = smov [#allocation2]   ;;  %s991_s11 = scalar_lea.hbm %s1497_s2, 4608 }
  0x10   : > { %s1506_s30 = scalar_select %p1180_p10, 1, 0 }
  0x11   : > { %s175_s7 = sshll.u32 %s1087_s6, 4  ;;  %p932_p11 = pneg %p1180_p10  ;;  %s176_s7 = int_to_ptr.vmem [resolvable:$true] %s175_s7 }
  0x12   : > { %p992_p13 = scmp.ne.s32.totalorder %s1497_s2, %s991_s11  ;;  %p998_p3 = scmp.lt.u32.totalorder %s991_s11, %s1497_s2 }
  0x13   : > { %p1188_p12 = pnand %p1501_p9, %p932_p11 }
  0x15   : > { %p993_p0 = pneg %p1188_p12 }
  0x17   : > { %p994_p1 = pnand %p993_p0, %p992_p13 }
  0x19   : > { %p995_p2 = pneg %p994_p1 }
  0x1b   : > { %p1000_p4 = pnand %p998_p3, %p995_p2 }
  0x1d   : > { %1003 = shalt.err (!%p1000_p4)
}
  0x1e   : > { %s1004_s16 = scalar_lea.vmem %s176_s7, 4608  ;;  %p1012_p9 = scmp.lt.s32.totalorder %s176_s7, %s176_s7 }
  0x1f   : > { %p1005_p7 = scmp.ne.s32.totalorder %s176_s7, %s1004_s16  ;;  %p1013_p6 = scmp.lt.s32.totalorder %s1004_s16, %s1004_s16 }
  0x21   : > { %p1007_p8 = pnand %p1005_p7, %p993_p0  ;;  %p1014_p5 = por %p1013_p6, %p1012_p9 }
  0x23   : > { %p1008_p11 = pneg %p1007_p8 }
  0x25   : > { %p1015_p10 = pnand %p1014_p5, %p1008_p11 }
  0x27   : > { %1018 = shalt.err (!%p1015_p10)
}
  0x28   : > { %s1088_s17 = smov 256   ;;  %s1089_s23 = smov 16  }
  0x29   : > { %935 = dma.hbm_to_vmem [thread:$0]  (!%p1188_p12), %s1497_s2, 4608, %s176_s7, [#allocation3], %s1088_s17, %s1088_s17, %s1089_s23  }
  0x2a   : > { %p1508_p13 = scmp.ne.s32.totalorder %s1506_s30, 0 }
  0x2b   : > { %p1509_p1 = scmp.eq.s32.totalorder (!%p1508_p13), %s1152_s22, 0 }
  0x2c   : > { %206 = sbr.rel (%p1508_p13) target bundleno = 1310 (0x51e), region = 40 }
  0x33   : > { %1064 = dma.done.wait (%p1509_p1), [#allocation3], 4608   ;;  %p1510_p0 = pmov %p1509_p1 }
  0x34   : > { %s903_s6 = sshll.u32 %s1152_s22, 1  ;;  %v1090_v0 = vmov 0   ;;  %vm263_vm0 = vcmask 1041408   ;;  %v243_v2 = vld [vmem:[%s1499_s4] sm:$0xff]  ;;  %v244_v5 = vld [vmem:[%s1499_s4 + $0x8] sm:$0xff]  ;;  %vm259_vm1 = vcmask 31744   ;;  %v331_v35 = vlaneseq }
  0x35   : > { %1066 = vsyncadd (%p1510_p0), [#allocation3], 4294962688  ;;  %p235_p5 = scmp.lt.s32.totalorder %s903_s6, 3  ;;  %302 = vmatprep.mubr.bf16.mxu0 %v1090_v0  ;;  %988 = vset.pattern.permute.xlu0 %v1090_v0  ;;  %v248_v8 = vld [vmem:[%s1496_s1] sm:$0xf]  ;;  %s1091_s16 = smov 16  }
  0x36   : > { %989 = vset.pattern.permute.xlu1 %v1090_v0  ;;  %504 = vmatprep.mubr.bf16.mxu1 %v1090_v0  ;;  %s1092_s17 = smov 17   ;;  %s1093_s23 = smov 15   ;;  %v245_v21 = vld [vmem:[%s1499_s4 + $0x10] sm:$0xff]  ;;  %v247_v22 = vld [vmem:[%s1499_s4 + $0x20] sm:$0xff]  ;;  %v246_v24 = vld [vmem:[%s1499_s4 + $0x18] sm:$0xff]  ;;  %v1293_v37 = vand.u32 127, %v331_v35 }
  0x37   : > { %s1518_s6 = smov (!%p235_p5, %s903_s6), 3  ;;  %256 = vperm.xlu0 %988, %v243_v2   ;;  %s1094_s25 = smov 1   ;;  %v910_v23 = vld [vmem:[%s1499_s4 + $0x30] sm:$0xff]  ;;  %v909_v25 = vld [vmem:[%s1499_s4 + $0x28] sm:$0xff]  ;;  %v409_v44 = vld [vmem:[#allocation2 + $0x78] sm:$0xff]  ;;  %vm465_vm14 = vcmask 1043456  }
  0x38   : > { %s904_s30 = sshll.u32 %s1518_s6, 2  ;;  %s1095_s26 = smov 127   ;;  %vm333_vm4 = vcmp.lt.s32.totalorder %v1293_v37, 17  ;;  %vm356_vm5 = vcmp.lt.s32.totalorder %v1293_v37, 15  ;;  %vm404_vm6 = vcmp.lt.s32.totalorder %v1293_v37, 112  ;;  %vm380_vm7 = vcmp.lt.s32.totalorder %v1293_v37, 127 }
  0x39   : > { %s238_s9 = scalar_lea.vmem %s1495_s0, %s904_s30  ;;  %s1096_s6 = smov 113   ;;  %vm392_vm8 = vcmp.lt.s32.totalorder %v1293_v37, 113  ;;  %vm344_vm9 = vcmp.lt.s32.totalorder %v1293_v37, 16  ;;  %vm368_vm10 = vcmp.lt.s32.totalorder %v1293_v37, 1  ;;  %v408_v43 = vld [vmem:[#allocation2 + $0x70] sm:$0xff]  ;;  %v336_v46 = vld [vmem:[#allocation2] sm:$0xff] }
  0x3a   : > { %v1222_v1 = vld [vmem:[%s238_s9] sm:$0xff]  ;;  %s1097_s30 = smov 112   ;;  %s1098_s9 = smov 111   ;;  %v361_v48 = vld [vmem:[#allocation2 + $0x28] sm:$0xff]  ;;  %v384_v51 = vld [vmem:[#allocation2 + $0x50] sm:$0xff]  ;;  %vm416_vm11 = vcmp.lt.s32.totalorder %v1293_v37, 111 }
  0x3b   : > { %v250_v3 = vcombine.high %v1222_v1, %v1222_v1  ;;  %v252_v4 = vpack.c.bf16 %v1222_v1, %v1222_v1  ;;  %315 = vperm.xlu0 %988, %v244_v5   ;;  %v360_v47 = vld [vmem:[#allocation2 + $0x20] sm:$0xff]  ;;  %v385_v54 = vld [vmem:[#allocation2 + $0x58] sm:$0xff]  ;;  %v397_v58 = vld [vmem:[#allocation2 + $0x68] sm:$0xff]  ;;  %vm461_vm15 = vcmask 64512   ;;  %s231_s14 = sand.u32 1, %s1077_s19   ;;  %s925_s7 = sshll.u32 %s1152_s22, 7 }
  0x3c   : > { %v396_v57 = vld [vmem:[#allocation2 + $0x60] sm:$0xff]  ;;  %v337_v61 = vld [vmem:[#allocation2 + $0x8] sm:$0xff]  ;;  %v348_v62 = vld [vmem:[#allocation2 + $0x10] sm:$0xff]  ;;  %s902_s15 = sshll.u32 %s231_s14, 3  ;;  %s1453_s13 = scalar_lea.hbm %s1500_s5, %s925_s7 }
  0x3d   : > { %v253_v6 = vpack.c.bf16 %v250_v3, %v250_v3  ;;  %v265_v7 = vsel %vm263_vm0, %v252_v4, 0  ;;  %v349_v63 = vld [vmem:[#allocation2 + $0x18] sm:$0xff]  ;;  %s233_s8 = scalar_lea.vmem [#allocation5], %s902_s15  ;;  %p1511_p9 = scmp.ne.s32.totalorder %s1504_s28, 0 }
  0x3e   : > { %s825_s10 = sshll.u32 %s233_s8, 4  ;;  %s1455_s10 = int_to_ptr.vmem [resolvable:$true] %s825_s10 }
  0x3f   : > { %905 = vmatprep.subr.msk.bf16.mxu0 %vm263_vm0, %v253_v6  ;;  %s1019_s22 = scalar_lea.vmem %s1455_s10, 128 }
  0x40   : > { %271 = vmatpush1.bf16.msra.mxu0 %v265_v7  ;;  %p1020_p6 = scmp.ne.s32.totalorder %s1455_s10, %s1019_s22 }
  0x42   : > { %p1021_p10 = pnand %p1020_p6, %p1511_p9 }
  0x43   : > { %906 = vmatmul.mubr.msk.bf16.vlgmr.msra.gmra.mrb[0].mxu0 %vm259_vm1, %v248_v8  ;;  %v372_v8 = vld [vmem:[#allocation2 + $0x30] sm:$0xff] }
  0x44   : > { %590 = vmatprep.mubr.bf16.mxu0 %v1090_v0  ;;  %p1022_p12 = pneg %p1021_p10 }
  0xb6   : > { %v257_v9 = vpop.permute.xlu0 %256 }
  0xba   : > { %v316_v13 = vpop.permute.xlu0 %315 }
 0x116   : > { %v304_v10 = vpop.f32.mrb[0].mxu0 }
 0x117   : > { %v305_v11 = vadd.f32 %v304_v10, %v257_v9  ;;  %v306_v12 = vpop.f32.mrb[1].mxu0 }
 0x118   : > { %v307_v14 = vadd.f32 %v306_v12, %v257_v9  ;;  %v308_v15 = vpop.f32.mrb[2].mxu0  ;;  %v373_v9 = vld [vmem:[#allocation2 + $0x38] sm:$0xff]  ;;  %v323_v12 = vld [vmem:[#allocation2 + $0x40] sm:$0xff] }
 0x119   : > { %vm311_vm2 = vcmp.gt.f32.partialorder %v305_v11, 0.0  ;;  %v318_v16 = vmul.f32 %v316_v13, %v305_v11  ;;  %v309_v17 = vpop.f32.mrb[3].mxu0 }
 0x11a   : > { %v319_v19 = vmul.f32 %v316_v13, %v307_v14  ;;  %vm312_vm3 = vcmp.gt.f32.partialorder %v307_v14, 0.0  ;;  %v324_v13 = vld [vmem:[#allocation2 + $0x48] sm:$0xff] }
 0x11b   : > { %v1241_v18 = vsel %vm311_vm2, %v305_v11, %v318_v16 }
 0x11c   : > { %340 = vrot.lane.b32.xlu0 %v1241_v18, %s1091_s16  ;;  %327 = vrot.lane.b32.xlu1 %v1241_v18, %s1092_s17  ;;  %v1247_v20 = vsel %vm312_vm3, %v307_v14, %v319_v19 }
 0x120   : > { %352 = vrot.lane.b32.xlu0 %v1241_v18, %s1093_s23  ;;  %329 = vrot.lane.b32.xlu1 %v1247_v20, %s1092_s17 }
 0x124   : > { %364 = vrot.lane.b32.xlu0 %v1241_v18, %s1094_s25  ;;  %342 = vrot.lane.b32.xlu1 %v1247_v20, %s1091_s16 }
 0x128   : > { %376 = vrot.lane.b32.xlu0 %v1241_v18, %s1095_s26  ;;  %354 = vrot.lane.b32.xlu1 %v1247_v20, %s1093_s23 }
 0x12c   : > { %388 = vrot.lane.b32.xlu0 %v1241_v18, %s1096_s6  ;;  %366 = vrot.lane.b32.xlu1 %v1247_v20, %s1094_s25 }
 0x130   : > { %400 = vrot.lane.b32.xlu0 %v1241_v18, %s1097_s30  ;;  %378 = vrot.lane.b32.xlu1 %v1247_v20, %s1095_s26 }
 0x134   : > { %442 = vperm.xlu0 %988, %v245_v21   ;;  %390 = vrot.lane.b32.xlu1 %v1247_v20, %s1096_s6 }
 0x138   : > { %414 = vrot.lane.b32.xlu0 %v1247_v20, %s1098_s9  ;;  %402 = vrot.lane.b32.xlu1 %v1247_v20, %s1097_s30 }
 0x13c   : > { %520 = vperm.xlu0 %988, %v247_v22   ;;  %412 = vrot.lane.b32.xlu1 %v1241_v18, %s1098_s9 }
 0x140   : > { %603 = vperm.xlu0 %988, %v910_v23   ;;  %451 = vperm.xlu1 %989, %v246_v24  }
 0x144   : > { %546 = vperm.xlu1 %989, %v909_v25  }
 0x18e   : > { %v341_v26 = vpop.permute.xlu0 %340  ;;  %v328_v27 = vpop.permute.xlu1 %327 }
 0x192   : > { %v353_v28 = vpop.permute.xlu0 %352  ;;  %v330_v29 = vpop.permute.xlu1 %329 }
 0x193   : > { %v334_v40 = vsel %vm333_vm4, %v328_v27, %v330_v29  ;;  %v335_v41 = vsel %vm333_vm4, %v330_v29, %v328_v27  ;;  %v325_v29 = vmul.f32 %v323_v12, %v1241_v18 }
 0x194   : > { %v338_v19 = vmul.f32 %v336_v46, %v335_v41  ;;  %v339_v21 = vmul.f32 %v337_v61, %v334_v40  ;;  %v420_v41 = vld [vmem:[#allocation2 + $0x80] sm:$0xff] }
 0x196   : > { %v343_v30 = vpop.permute.xlu1 %342  ;;  %v365_v31 = vpop.permute.xlu0 %364 }
 0x197   : > { %v345_v2 = vsel %vm344_vm9, %v341_v26, %v343_v30  ;;  %v346_v3 = vsel %vm344_vm9, %v343_v30, %v341_v26 }
 0x198   : > { %v350_v22 = vmul.f32 %v348_v62, %v346_v3  ;;  %v351_v23 = vmul.f32 %v349_v63, %v345_v2  ;;  %v458_v63 = vld [vmem:[%s1498_s3] sm:$0x3]  ;;  %v1099_v2 = vmov 839922192  }
 0x199   : > { %v523_v3 = vunpack.c.l.s4 %v1099_v2  ;;  %v677_v2 = vld [vmem:[#allocation2 + $0xf0] sm:$0xff] }
 0x19a   : > { %v355_v32 = vpop.permute.xlu1 %354  ;;  %v377_v33 = vpop.permute.xlu0 %376 }
 0x19b   : > { %v357_v49 = vsel %vm356_vm5, %v353_v28, %v355_v32  ;;  %v358_v50 = vsel %vm356_vm5, %v355_v32, %v353_v28  ;;  %v326_v28 = vmul.f32 %v324_v13, %v1247_v20 }
 0x19c   : > { %v362_v6 = vmul.f32 %v360_v47, %v358_v50  ;;  %v363_v7 = vmul.f32 %v361_v48, %v357_v49 }
 0x19e   : > { %v367_v34 = vpop.permute.xlu1 %366  ;;  %v389_v38 = vpop.permute.xlu0 %388  ;;  %v426_v30 = vadd.f32 %v362_v6, %v350_v22 }
 0x19f   : > { %v369_v10 = vsel %vm368_vm10, %v365_v31, %v367_v34  ;;  %v370_v11 = vsel %vm368_vm10, %v367_v34, %v365_v31  ;;  %v427_v31 = vadd.f32 %v363_v7, %v351_v23 }
 0x1a0   : > { %v374_v24 = vmul.f32 %v372_v8, %v370_v11  ;;  %v375_v25 = vmul.f32 %v373_v9, %v369_v10 }
 0x1a2   : > { %v379_v36 = vpop.permute.xlu1 %378  ;;  %v401_v42 = vpop.permute.xlu0 %400 }
 0x1a3   : > { %v381_v55 = vsel %vm380_vm7, %v377_v33, %v379_v36  ;;  %v382_v56 = vsel %vm380_vm7, %v379_v36, %v377_v33  ;;  %v424_v36 = vadd.f32 %v338_v19, %v325_v29  ;;  %v914_v19 = vld [vmem:[%s1496_s1 + $0x4] sm:$0xf] }
 0x1a4   : > { %v386_v14 = vmul.f32 %v384_v51, %v381_v55  ;;  %v387_v15 = vmul.f32 %v385_v54, %v382_v56 }
 0x1a6   : > { %v391_v39 = vpop.permute.xlu1 %390  ;;  %v428_v32 = vadd.f32 %v386_v14, %v374_v24  ;;  %v429_v33 = vadd.f32 %v387_v15, %v375_v25 }
 0x1a7   : > { %v393_v59 = vsel %vm392_vm8, %v389_v38, %v391_v39  ;;  %v394_v60 = vsel %vm392_vm8, %v391_v39, %v389_v38  ;;  %v425_v38 = vadd.f32 %v339_v21, %v326_v28 }
 0x1a8   : > { %v398_v16 = vmul.f32 %v396_v57, %v393_v59  ;;  %v399_v17 = vmul.f32 %v397_v58, %v394_v60 }
 0x1aa   : > { %v403_v45 = vpop.permute.xlu1 %402 }
 0x1ab   : > { %v405_v52 = vsel %vm404_vm6, %v401_v42, %v403_v45  ;;  %v406_v53 = vsel %vm404_vm6, %v403_v45, %v401_v42  ;;  %v421_v42 = vld [vmem:[#allocation2 + $0x88] sm:$0xff] }
 0x1ac   : > { %v410_v4 = vmul.f32 %v408_v43, %v405_v52  ;;  %v411_v5 = vmul.f32 %v409_v44, %v406_v53  ;;  %v432_v43 = vadd.f32 %v426_v30, %v424_v36  ;;  %v433_v44 = vadd.f32 %v427_v31, %v425_v38 }
 0x1ae   : > { %v430_v26 = vadd.f32 %v410_v4, %v398_v16  ;;  %v431_v27 = vadd.f32 %v411_v5, %v399_v17  ;;  %v413_v45 = vpop.permute.xlu1 %412  ;;  %v524_v4 = vunpack.c.0.s8 %v523_v3  ;;  %v526_v5 = vshrl.u32 %v331_v35, 7  ;;  %v678_v3 = vld [vmem:[#allocation2 + $0xf8] sm:$0xff] }
 0x1b0   : > { %v434_v39 = vadd.f32 %v430_v26, %v428_v32  ;;  %v435_v40 = vadd.f32 %v431_v27, %v429_v33  ;;  %v1345_v6 = vsub.s32 %v524_v4, %v526_v5  ;;  %v911_v32 = vld [vmem:[%s1499_s4 + $0x38] sm:$0xff]  ;;  %v912_v33 = vld [vmem:[%s1499_s4 + $0x40] sm:$0xff] }
 0x1b2   : > { %v436_v49 = vadd.f32 %v434_v39, %v432_v43  ;;  %v437_v50 = vadd.f32 %v435_v40, %v433_v44 }
 0x1b3   : > { %v443_v34 = vpop.permute.xlu0 %442 }
 0x1b7   : > { %v415_v46 = vpop.permute.xlu0 %414 }
 0x1b8   : > { %v417_v18 = vsel %vm416_vm11, %v413_v45, %v415_v46  ;;  %v418_v20 = vsel %vm416_vm11, %v415_v46, %v413_v45 }
 0x1b9   : > { %v422_v47 = vmul.f32 %v420_v41, %v417_v18  ;;  %v423_v48 = vmul.f32 %v421_v42, %v418_v20 }
 0x1bb   : > { %v438_v51 = vadd.f32 %v436_v49, %v422_v47  ;;  %v439_v52 = vadd.f32 %v437_v50, %v423_v48  ;;  %v521_v8 = vpop.permute.xlu0 %520  ;;  %v688_v49 = vld [vmem:[#allocation2 + $0x100] sm:$0xff]  ;;  %v689_v50 = vld [vmem:[#allocation2 + $0x108] sm:$0xff] }
 0x1bc   : > { %v528_v13 = vrot.slane %v521_v8, %v1345_v6  ;;  %v633_v8 = vld [vmem:[#allocation2 + $0xa0] sm:$0xff] }
 0x1bd   : > { %v446_v53 = vadd.f32 %v443_v34, %v439_v52  ;;  %v445_v54 = vadd.f32 %v443_v34, %v438_v51  ;;  %v913_v34 = vld [vmem:[%s1499_s4 + $0x48] sm:$0xff] }
 0x1bf   : > { %v452_v55 = vpop.permute.xlu1 %451  ;;  %vm448_vm12 = vcmp.gt.f32.partialorder %v446_v53, 0.0  ;;  %vm447_vm13 = vcmp.gt.f32.partialorder %v445_v54, 0.0  ;;  %v604_v24 = vpop.permute.xlu0 %603 }
 0x1c0   : > { %v454_v56 = vmul.f32 %v452_v55, %v445_v54  ;;  %v455_v57 = vmul.f32 %v452_v55, %v446_v53 }
 0x1c2   : > { %v457_v58 = vsel %vm448_vm12, %v446_v53, %v455_v57  ;;  %v456_v59 = vsel %vm447_vm13, %v445_v54, %v454_v56  ;;  %v622_v53 = vld [vmem:[#allocation2 + $0x90] sm:$0xff]  ;;  %v645_v57 = vld [vmem:[#allocation2 + $0xb8] sm:$0xff] }
 0x1c3   : > { %v460_v60 = vpack.c.bf16 %v457_v58, %v457_v58  ;;  %v459_v61 = vpack.c.bf16 %v456_v59, %v456_v59  ;;  %v644_v56 = vld [vmem:[#allocation2 + $0xb0] sm:$0xff] }
 0x1c5   : > { %907 = vmatprep.subr.msk.bf16.mxu1 %vm465_vm14, %v460_v60  ;;  %v467_v62 = vsel %vm465_vm14, %v459_v61, 0  ;;  %v666_v60 = vld [vmem:[#allocation2 + $0xe0] sm:$0xff]  ;;  %v667_v61 = vld [vmem:[#allocation2 + $0xe8] sm:$0xff] }
 0x1c6   : > { %473 = vmatpush1.bf16.msra.mxu1 %v467_v62 }
 0x1c9   : > { %908 = vmatmul.mubr.msk.bf16.vlgmr.msra.gmra.mrb[0].mxu1 %vm461_vm15, %v458_v63 }
 0x1ca   : > { %782 = vmatprep.mubr.bf16.mxu1 %v1090_v0 }
 0x29c   : > { %v506_v7 = vpop.f32.mrb[0].mxu1 }
 0x29d   : > { %v508_v9 = vpop.f32.mrb[1].mxu1 }
 0x29e   : > { %v515_v10 = vcombine.low %v506_v7, %v508_v9  ;;  %v510_v11 = vpop.f32.mrb[2].mxu1  ;;  %v623_v7 = vld [vmem:[#allocation2 + $0x98] sm:$0xff]  ;;  %v634_v9 = vld [vmem:[#allocation2 + $0xa8] sm:$0xff] }
 0x29f   : > { %v511_v12 = vpop.f32.mrb[3].mxu1 }
 0x2a0   : > { %v517_v14 = vadd.f32 %v515_v10, %v1222_v1  ;;  %v547_v1 = vpop.permute.xlu1 %546 }
 0x2a2   : > { %v1349_v15 = vadd.f32 %v528_v13, %v517_v14 }
 0x2a4   : > { %v540_v0 = vcombine.high %v1349_v15, %v1349_v15  ;;  %v542_v35 = vpack.c.bf16 %v1349_v15, %v1349_v15 }
 0x2a6   : > { %v543_v16 = vpack.c.bf16 %v540_v0, %v540_v0  ;;  %v553_v17 = vsel %vm263_vm0, %v542_v35, 0  ;;  %v655_v35 = vld [vmem:[#allocation2 + $0xc0] sm:$0xff] }
 0x2a8   : > { %915 = vmatprep.subr.msk.bf16.mxu0 %vm263_vm0, %v543_v16  ;;  %v656_v16 = vld [vmem:[#allocation2 + $0xc8] sm:$0xff] }
 0x2a9   : > { %559 = vmatpush1.bf16.msra.mxu0 %v553_v17 }
 0x2ac   : > { %916 = vmatmul.mubr.msk.bf16.vlgmr.msra.gmra.mrb[4].mxu0 %vm259_vm1, %v914_v19 }
 0x37f   : > { %v592_v21 = vpop.f32.mrb[4].mxu0 }
 0x380   : > { %v593_v22 = vadd.f32 %v592_v21, %v547_v1  ;;  %v594_v23 = vpop.f32.mrb[5].mxu0  ;;  %v612_v21 = vld [vmem:[#allocation2 + $0xd8] sm:$0xff] }
 0x381   : > { %v595_v25 = vadd.f32 %v594_v23, %v547_v1  ;;  %v596_v26 = vpop.f32.mrb[6].mxu0  ;;  %v611_v1 = vld [vmem:[#allocation2 + $0xd0] sm:$0xff] }
 0x382   : > { %vm599_vm2 = vcmp.gt.f32.partialorder %v593_v22, 0.0  ;;  %v606_v27 = vmul.f32 %v604_v24, %v593_v22  ;;  %v597_v28 = vpop.f32.mrb[7].mxu0 }
 0x383   : > { %vm600_vm3 = vcmp.gt.f32.partialorder %v595_v25, 0.0  ;;  %v607_v29 = vmul.f32 %v604_v24, %v595_v25 }
 0x384   : > { %v1361_v30 = vsel %vm599_vm2, %v593_v22, %v606_v27 }
 0x385   : > { %v1363_v31 = vsel %vm600_vm3, %v595_v25, %v607_v29  ;;  %615 = vrot.lane.b32.xlu1 %v1361_v30, %s1092_s17 }
 0x386   : > { %617 = vrot.lane.b32.xlu0 %v1363_v31, %s1092_s17  ;;  %s1100_s17 = smov [#allocation5]  }
 0x389   : > { %626 = vrot.lane.b32.xlu1 %v1361_v30, %s1091_s16 }
 0x38a   : > { %628 = vrot.lane.b32.xlu0 %v1363_v31, %s1091_s16  ;;  %s811_s16 = scalar_lea.sflag [#allocation4], %s231_s14 }
 0x38d   : > { %637 = vrot.lane.b32.xlu1 %v1361_v30, %s1093_s23 }
 0x38e   : > { %639 = vrot.lane.b32.xlu0 %v1363_v31, %s1093_s23  ;;  %s1023_s23 = sshll.u32 %s1100_s17, 4  ;;  %s1024_s23 = int_to_ptr.vmem [resolvable:$false] %s1023_s23 }
 0x38f   : > { %p1026_p2 = scmp.lt.s32.totalorder %s1455_s10, %s1024_s23 }
 0x391   : > { %648 = vrot.lane.b32.xlu1 %v1361_v30, %s1094_s25 }
 0x392   : > { %650 = vrot.lane.b32.xlu0 %v1363_v31, %s1094_s25  ;;  %s1025_s25 = scalar_lea.vmem %s1024_s23, 256 }
 0x393   : > { %p1027_p3 = scmp.lt.s32.totalorder %s1025_s25, %s1019_s22 }
 0x395   : > { %659 = vrot.lane.b32.xlu1 %v1361_v30, %s1095_s26  ;;  %p1028_p4 = por %p1027_p3, %p1026_p2 }
 0x396   : > { %661 = vrot.lane.b32.xlu0 %v1363_v31, %s1095_s26 }
 0x397   : > { %p1029_p7 = pnand %p1028_p4, %p1022_p12 }
 0x399   : > { %670 = vrot.lane.b32.xlu1 %v1361_v30, %s1096_s6 }
 0x39a   : > { %672 = vrot.lane.b32.xlu0 %v1363_v31, %s1096_s6 }
 0x39d   : > { %681 = vrot.lane.b32.xlu1 %v1361_v30, %s1097_s30 }
 0x39e   : > { %683 = vrot.lane.b32.xlu0 %v1363_v31, %s1097_s30 }
 0x3a1   : > { %721 = vperm.xlu1 %989, %v911_v32  }
 0x3a2   : > { %692 = vrot.lane.b32.xlu0 %v1361_v30, %s1098_s9 }
 0x3a5   : > { %694 = vrot.lane.b32.xlu1 %v1363_v31, %s1098_s9 }
 0x3a6   : > { %730 = vperm.xlu0 %988, %v912_v33  }
 0x3a9   : > { %798 = vperm.xlu1 %989, %v913_v34  }
 0x3f7   : > { %v616_v36 = vpop.permute.xlu1 %615 }
 0x3f8   : > { %v618_v38 = vpop.permute.xlu0 %617 }
 0x3f9   : > { %v619_v54 = vsel %vm333_vm4, %v616_v36, %v618_v38  ;;  %v620_v55 = vsel %vm333_vm4, %v618_v38, %v616_v36  ;;  %v613_v38 = vmul.f32 %v611_v1, %v1361_v30 }
 0x3fa   : > { %v624_v26 = vmul.f32 %v622_v53, %v620_v55  ;;  %v625_v27 = vmul.f32 %v623_v7, %v619_v54  ;;  %v917_v7 = vld [vmem:[%s1498_s3 + $0x2] sm:$0x3] }
 0x3fb   : > { %v627_v39 = vpop.permute.xlu1 %626 }
 0x3fc   : > { %v629_v40 = vpop.permute.xlu0 %628 }
 0x3fd   : > { %v630_v10 = vsel %vm344_vm9, %v627_v39, %v629_v40  ;;  %v631_v11 = vsel %vm344_vm9, %v629_v40, %v627_v39  ;;  %v614_v39 = vmul.f32 %v612_v21, %v1363_v31 }
 0x3fe   : > { %v635_v28 = vmul.f32 %v633_v8, %v631_v11  ;;  %v636_v29 = vmul.f32 %v634_v9, %v630_v10 }
 0x3ff   : > { %v638_v41 = vpop.permute.xlu1 %637 }
 0x400   : > { %v640_v42 = vpop.permute.xlu0 %639 }
 0x401   : > { %v641_v58 = vsel %vm356_vm5, %v638_v41, %v640_v42  ;;  %v642_v59 = vsel %vm356_vm5, %v640_v42, %v638_v41 }
 0x402   : > { %v646_v14 = vmul.f32 %v644_v56, %v642_v59  ;;  %v647_v0 = vmul.f32 %v645_v57, %v641_v58 }
 0x403   : > { %v649_v43 = vpop.permute.xlu1 %648 }
 0x404   : > { %v651_v44 = vpop.permute.xlu0 %650  ;;  %v705_v40 = vadd.f32 %v646_v14, %v635_v28  ;;  %v706_v41 = vadd.f32 %v647_v0, %v636_v29 }
 0x405   : > { %v652_v17 = vsel %vm368_vm10, %v649_v43, %v651_v44  ;;  %v653_v19 = vsel %vm368_vm10, %v651_v44, %v649_v43 }
 0x406   : > { %v657_v32 = vmul.f32 %v655_v35, %v653_v19  ;;  %v658_v33 = vmul.f32 %v656_v16, %v652_v17 }
 0x407   : > { %v660_v45 = vpop.permute.xlu1 %659 }
 0x408   : > { %v662_v46 = vpop.permute.xlu0 %661 }
 0x409   : > { %v663_v62 = vsel %vm380_vm7, %v660_v45, %v662_v46  ;;  %v664_v63 = vsel %vm380_vm7, %v662_v46, %v660_v45  ;;  %v703_v45 = vadd.f32 %v624_v26, %v613_v38  ;;  %v704_v46 = vadd.f32 %v625_v27, %v614_v39 }
 0x40a   : > { %v668_v22 = vmul.f32 %v666_v60, %v663_v62  ;;  %v669_v23 = vmul.f32 %v667_v61, %v664_v63 }
 0x40b   : > { %v671_v18 = vpop.permute.xlu1 %670 }
 0x40c   : > { %v673_v20 = vpop.permute.xlu0 %672  ;;  %v707_v42 = vadd.f32 %v668_v22, %v657_v32  ;;  %v708_v43 = vadd.f32 %v669_v23, %v658_v33 }
 0x40d   : > { %v674_v4 = vsel %vm392_vm8, %v671_v18, %v673_v20  ;;  %v675_v5 = vsel %vm392_vm8, %v673_v20, %v671_v18 }
 0x40e   : > { %v679_v24 = vmul.f32 %v677_v2, %v674_v4  ;;  %v680_v25 = vmul.f32 %v678_v3, %v675_v5 }
 0x40f   : > { %v682_v47 = vpop.permute.xlu1 %681 }
 0x410   : > { %v684_v48 = vpop.permute.xlu0 %683 }
 0x411   : > { %v685_v51 = vsel %vm404_vm6, %v682_v47, %v684_v48  ;;  %v686_v52 = vsel %vm404_vm6, %v684_v48, %v682_v47  ;;  %v699_v47 = vld [vmem:[#allocation2 + $0x110] sm:$0xff]  ;;  %v700_v48 = vld [vmem:[#allocation2 + $0x118] sm:$0xff] }
 0x412   : > { %v690_v12 = vmul.f32 %v688_v49, %v685_v51  ;;  %v691_v13 = vmul.f32 %v689_v50, %v686_v52  ;;  %v711_v49 = vadd.f32 %v705_v40, %v703_v45  ;;  %v712_v50 = vadd.f32 %v706_v41, %v704_v46 }
 0x414   : > { %v709_v34 = vadd.f32 %v690_v12, %v679_v24  ;;  %v710_v36 = vadd.f32 %v691_v13, %v680_v25  ;;  %v693_v51 = vpop.permute.xlu0 %692 }
 0x416   : > { %v713_v18 = vadd.f32 %v709_v34, %v707_v42  ;;  %v714_v20 = vadd.f32 %v710_v36, %v708_v43 }
 0x418   : > { %v716_v53 = vadd.f32 %v714_v20, %v712_v50  ;;  %v715_v56 = vadd.f32 %v713_v18, %v711_v49 }
 0x420   : > { %v722_v44 = vpop.permute.xlu1 %721 }
 0x424   : > { %v695_v52 = vpop.permute.xlu1 %694 }
 0x425   : > { %v696_v30 = vsel %vm416_vm11, %v693_v51, %v695_v52  ;;  %v697_v31 = vsel %vm416_vm11, %v695_v52, %v693_v51  ;;  %v731_v61 = vpop.permute.xlu0 %730 }
 0x426   : > { %v701_v54 = vmul.f32 %v699_v47, %v696_v30  ;;  %v702_v55 = vmul.f32 %v700_v48, %v697_v31 }
 0x428   : > { %v717_v57 = vadd.f32 %v715_v56, %v701_v54  ;;  %v718_v58 = vadd.f32 %v716_v53, %v702_v55  ;;  %v799_v9 = vpop.permute.xlu1 %798 }
 0x429   : > { %v806_v14 = vrot.slane %v799_v9, %v1345_v6 }
 0x42a   : > { %v724_v59 = vadd.f32 %v722_v44, %v717_v57  ;;  %v725_v60 = vadd.f32 %v722_v44, %v718_v58 }
 0x42c   : > { %vm726_vm0 = vcmp.gt.f32.partialorder %v724_v59, 0.0  ;;  %vm727_vm1 = vcmp.gt.f32.partialorder %v725_v60, 0.0  ;;  %v733_v62 = vmul.f32 %v731_v61, %v724_v59  ;;  %v734_v63 = vmul.f32 %v731_v61, %v725_v60 }
 0x42e   : > { %v735_v2 = vsel %vm726_vm0, %v724_v59, %v733_v62  ;;  %v736_v3 = vsel %vm727_vm1, %v725_v60, %v734_v63 }
 0x42f   : > { %v739_v4 = vpack.c.bf16 %v735_v2, %v735_v2  ;;  %v740_v37 = vpack.c.bf16 %v736_v3, %v736_v3 }
 0x431   : > { %918 = vmatprep.subr.msk.bf16.mxu1 %vm465_vm14, %v740_v37  ;;  %v745_v5 = vsel %vm465_vm14, %v739_v4, 0 }
 0x432   : > { %751 = vmatpush1.bf16.msra.mxu1 %v745_v5 }
 0x435   : > { %919 = vmatmul.mubr.msk.bf16.vlgmr.msra.gmra.mrb[4].mxu1 %vm461_vm15, %v917_v7 }
 0x508   : > { %v784_v8 = vpop.f32.mrb[4].mxu1 }
 0x509   : > { %v786_v10 = vpop.f32.mrb[5].mxu1 }
 0x50a   : > { %v793_v11 = vcombine.low %v784_v8, %v786_v10  ;;  %v788_v12 = vpop.f32.mrb[6].mxu1 }
 0x50b   : > { %v789_v13 = vpop.f32.mrb[7].mxu1 }
 0x50c   : > { %v795_v0 = vadd.f32 %v793_v11, %v1349_v15 }
 0x50e   : > { %v808_v35 = vadd.f32 %v806_v14, %v795_v0 }
 0x510   : > { %809 = vst [vmem:[%s233_s8] sm:$0xff] %v808_v35 }
 0x511   : > { %1032 = shalt.err (!%p1029_p7)
}
 0x512   : > { %s1033_s26 = scalar_lea.hbm %s1453_s13, 128  ;;  %s1037_s9 = scalar_lea.hbm %s1500_s5, 256 }
 0x513   : > { %p1034_p8 = scmp.ne.s32.totalorder %s1453_s13, %s1033_s26  ;;  %p1038_p1 = scmp.lt.u32.totalorder %s1453_s13, %s1500_s5 }
 0x514   : > { %p1039_p0 = scmp.lt.u32.totalorder %s1037_s9, %s1033_s26  ;;  %p1041_p6 = scmp.lt.u32.totalorder %s1033_s26, %s1453_s13 }
 0x515   : > { %p1035_p11 = pnand %p1034_p8, %p1511_p9 }
 0x516   : > { %p1040_p5 = por %p1039_p0, %p1038_p1 }
 0x517   : > { %p1036_p13 = pneg %p1035_p11 }
 0x518   : > { %p1042_p10 = por %p1041_p6, %p1040_p5 }
 0x51a   : > { %p1043_p12 = pnand %p1042_p10, %p1036_p13 }
 0x51c   : > { %1046 = shalt.err (!%p1043_p12)
}
 0x51d   : > { %930 = dma.vmem_to_hbm [thread:$0]  (%p1511_p9), %s1455_s10, 128, %s1453_s13, %s811_s16  }
 0x51e PF: > { %p942_p2 = scmp.ge.s32.totalorder %s1085_s21, 2  ;;  %s837_s7 = sand.u32 1, %s1073_s18  }
 0x51f   : > { %p1512_p3 = scmp.ne.s32.totalorder %s1505_s29, 0  ;;  %s838_s8 = scalar_lea.sflag [#allocation4], %s837_s7 }
 0x521   : > { %p937_p4 = pnand %p942_p2, %p1512_p3 }
 0x523   : > { %1068 = dma.done.wait (!%p937_p4), %s838_s8, 128  }
 0x524   : > { %1070 = vsyncadd (!%p937_p4), %s838_s8, 4294967168  ;;  %p16_p7 = scmp.ge.s32.totalorder %s1156_s24, 4   ;;  %s1513_s18 = smov %s1077_s19 }
 0x525   : > { %s1514_s19 = smov %s1081_s20  ;;  %s1515_s20 = smov %s1167_s27 }
 0x526   : > { %s1516_s21 = smov %s1156_s24  ;;  %18 = sbr.rel (!%p16_p7) target bundleno = 4 (0x4), region = 100 }
 0x52d   :  { %843 = vsyncpa [#allocation3], 1 }
 0x52e   :  { %845 = vsyncpa [#allocation3 + $0x1], 1 }
 0x52f   :  { %846 = vsyncpa [#allocation4], 1 }
 0x530   :  { %848 = vsyncpa [#allocation4 + $0x1], 1 }

</bundles_post_ra>
